<compile_context>
chip_gen: v5e
topology: v5e:2x2
jax: 0.10.0
libtpu: 0.0.40
codegen_flags: <defaults>
</compile_context>

<pallas_src>
import functools

import jax
import jax.numpy as jnp
from jax import lax
from jax.experimental import pallas as pl
from jax.experimental.pallas import tpu as pltpu

_EPS = 1e-5   # nn.BatchNorm2d default eps
_LANE = 128


def _round_up(x, m):
    return (x + m - 1) // m * m


# ---------------------------------------------------------------- kernel ----

def _fused_conv_kernel(*refs, taps, stride, out_h, out_w, apply_bn, has_add,
                       pad_out):
    """Fused [BN+ReLU] -> conv(taps, stride) -> bias [+ add] for one image.

    refs (in order; batch dim squeezed out by the BlockSpecs):
      x_ref          (Hp, Wp, Cinp)      spatially+channel padded input tile
      [scale, shift] (1, Cinp)           folded BN (only if apply_bn)
      w_ref          (len(taps)*Cinp, Coutp)  packed weights   (resident)
      b_ref          (1, Coutp)          bias                  (resident)
      [add_ref]      (out_h, out_w, Coutp)    shortcut tile (only if has_add)
      o_ref          (out_h(+2), out_w(+2), Coutp)
      [buf]          (Hp, Wp, Cinp) VMEM scratch (only if apply_bn)
    """
    it = iter(refs)
    x_ref = next(it)
    if apply_bn:
        scale_ref = next(it)
        shift_ref = next(it)
    w_ref = next(it)
    b_ref = next(it)
    add_ref = next(it) if has_add else None
    o_ref = next(it)
    buf = next(it) if apply_bn else None

    hp, wp, cinp = x_ref.shape
    coutp = o_ref.shape[-1]
    cdtype = w_ref.dtype            # MXU feed dtype (bf16 if weights are bf16)

    if apply_bn:
        # Prologue: y = relu(x * scale + shift) in f32, then force the
        # 1-pixel conv halo back to exactly zero (BN shift + ReLU would
        # otherwise pollute it) with an interior mask, single scratch store.
        y = (x_ref[...].astype(jnp.float32)
             * scale_ref[...].astype(jnp.float32)
             + shift_ref[...].astype(jnp.float32))
        y = jnp.maximum(y, 0.0)
        row = lax.broadcasted_iota(jnp.int32, (hp, wp), 0)
        col = lax.broadcasted_iota(jnp.int32, (hp, wp), 1)
        interior = ((row >= 1) & (row <= hp - 2)
                    & (col >= 1) & (col <= wp - 2))[:, :, None]
        buf[...] = jnp.where(interior, y, 0.0).astype(cdtype)
        src = buf
    else:
        src = x_ref

    def read(di, dj):
        if stride == 1:
            return src[pl.ds(di, out_h), pl.ds(dj, out_w), :]
        return src[pl.ds(di, out_h, stride=stride),
                   pl.ds(dj, out_w, stride=stride), :]

    # Gather the taps and do ONE packed matmul per tile (K = taps * Cinp).
    cols = [read(di, dj).astype(cdtype) for (di, dj) in taps]
    pmat = cols[0] if len(cols) == 1 else jnp.concatenate(cols, axis=-1)
    pmat = pmat.reshape(out_h * out_w, len(taps) * cinp)

    acc = jnp.dot(pmat, w_ref[...], preferred_element_type=jnp.float32)
    acc = acc + b_ref[...].astype(jnp.float32)
    if has_add:
        acc = acc + add_ref[...].reshape(out_h * out_w, coutp).astype(jnp.float32)
    res = acc.reshape(out_h, out_w, coutp).astype(o_ref.dtype)

    if pad_out:
        # Emit the output with its own 1-pixel zero ring so the next 3x3 conv
        # can consume it directly without a jnp.pad round trip.
        o_ref[...] = jnp.zeros(o_ref.shape, o_ref.dtype)
        o_ref[1:1 + out_h, 1:1 + out_w, :] = res
    else:
        o_ref[...] = res


# ---------------------------------------------------------------- wrapper ---

def _fused_conv(x_pad, w_packed, bias, *, taps, stride, out_h, out_w,
                scale=None, shift=None, add=None, pad_out=False):
    """x_pad: (N, Hp, Wp, Cinp) NHWC (spatial halo + lane-padded channels)."""
    n, hp, wp, cinp = x_pad.shape
    coutp = w_packed.shape[1]
    apply_bn = scale is not None
    has_add = add is not None
    out_hh = out_h + 2 if pad_out else out_h
    out_ww = out_w + 2 if pad_out else out_w

    kernel = functools.partial(
        _fused_conv_kernel, taps=tuple(taps), stride=stride, out_h=out_h,
        out_w=out_w, apply_bn=apply_bn, has_add=has_add, pad_out=pad_out)

    # Batch dim squeezed (None) everywhere -> 3-D refs inside the kernel.
    in_specs = [pl.BlockSpec((None, hp, wp, cinp), lambda nn: (nn, 0, 0, 0))]
    inputs = [x_pad]
    if apply_bn:
        in_specs += [pl.BlockSpec((1, cinp), lambda nn: (0, 0)),
                     pl.BlockSpec((1, cinp), lambda nn: (0, 0))]
        inputs += [scale.reshape(1, cinp), shift.reshape(1, cinp)]
    in_specs += [pl.BlockSpec(w_packed.shape, lambda nn: (0, 0)),
                 pl.BlockSpec((1, coutp), lambda nn: (0, 0))]
    inputs += [w_packed, bias.reshape(1, coutp)]
    if has_add:
        in_specs += [pl.BlockSpec((None, out_h, out_w, coutp),
                                  lambda nn: (nn, 0, 0, 0))]
        inputs += [add]

    scratch = [pltpu.VMEM((hp, wp, cinp), w_packed.dtype)] if apply_bn else []

    return pl.pallas_call(
        kernel,
        out_shape=jax.ShapeDtypeStruct((n, out_hh, out_ww, coutp), x_pad.dtype),
        grid_spec=pltpu.PrefetchScalarGridSpec(
            num_scalar_prefetch=0,
            grid=(n,),
            in_specs=in_specs,
            out_specs=pl.BlockSpec((None, out_hh, out_ww, coutp),
                                   lambda nn: (nn, 0, 0, 0)),
            scratch_shapes=scratch),
        compiler_params=pltpu.CompilerParams(
            dimension_semantics=("parallel",)),
    )(*inputs)


# ---------------------------------------------------------------- module ----

def init_wide_basic_params(key, in_channels, out_channels):
    ks = jax.random.split(key, 14)
    f32 = jnp.float32
    return {
        # BatchNorm2d(in_channels)
        "bn1_gamma": jax.random.uniform(ks[0], (in_channels,), f32, 0.5, 1.5),
        "bn1_beta":  0.1 * jax.random.normal(ks[1], (in_channels,), f32),
        "bn1_mean":  0.1 * jax.random.normal(ks[2], (in_channels,), f32),
        "bn1_var":   jax.random.uniform(ks[3], (in_channels,), f32, 0.5, 1.5),
        # Conv2d(in, out, 3, stride, padding=1)  -- stored HWIO
        "conv1_w": 0.1 * jax.random.normal(ks[4], (3, 3, in_channels, out_channels), f32),
        "conv1_b": 0.1 * jax.random.normal(ks[5], (out_channels,), f32),
        # BatchNorm2d(out_channels)
        "bn2_gamma": jax.random.uniform(ks[6], (out_channels,), f32, 0.5, 1.5),
        "bn2_beta":  0.1 * jax.random.normal(ks[7], (out_channels,), f32),
        "bn2_mean":  0.1 * jax.random.normal(ks[8], (out_channels,), f32),
        "bn2_var":   jax.random.uniform(ks[9], (out_channels,), f32, 0.5, 1.5),
        # Conv2d(out, out, 3, 1, padding=1)
        "conv2_w": 0.1 * jax.random.normal(ks[10], (3, 3, out_channels, out_channels), f32),
        "conv2_b": 0.1 * jax.random.normal(ks[11], (out_channels,), f32),
        # shortcut Conv2d(in, out, 1, stride)
        "sc_w": 0.1 * jax.random.normal(ks[12], (1, 1, in_channels, out_channels), f32),
        "sc_b": 0.1 * jax.random.normal(ks[13], (out_channels,), f32),
    }


def wide_basic_forward(x_nchw, params, in_channels, out_channels, stride):
    n, _, h, w = x_nchw.shape
    dtype = x_nchw.dtype
    cinp = _round_up(in_channels, _LANE)
    coutp = _round_up(out_channels, _LANE)

    # NCHW -> NHWC, pad once: 1-pixel spatial halo + channels to a lane
    # multiple (pad channels are zero and stay zero through the whole block).
    x = jnp.transpose(x_nchw, (0, 2, 3, 1))
    xp = jnp.pad(x, ((0, 0), (1, 1), (1, 1), (0, cinp - in_channels)))

    ho = (h - 1) // stride + 1
    wo = (w - 1) // stride + 1
    taps3 = [(i, j) for i in range(3) for j in range(3)]

    def fold_bn(g, b, m, v, cpad):
        inv = g / jnp.sqrt(v + _EPS)
        scale = jnp.zeros((cpad,), jnp.float32).at[:g.shape[0]].set(inv)
        shift = jnp.zeros((cpad,), jnp.float32).at[:g.shape[0]].set(b - m * inv)
        return scale, shift

    def pack_w(w_hwio, cip, cop):
        kh, kw, ci, co = w_hwio.shape
        wz = jnp.zeros((kh, kw, cip, cop), dtype)
        wz = wz.at[:, :, :ci, :co].set(w_hwio.astype(dtype))
        return wz.reshape(kh * kw * cip, cop)    # rows ordered (tap, cin)

    def pad_b(b, cop):
        return jnp.zeros((cop,), dtype).at[:b.shape[0]].set(b.astype(dtype))

    s1, t1 = fold_bn(params["bn1_gamma"], params["bn1_beta"],
                     params["bn1_mean"], params["bn1_var"], cinp)
    s2, t2 = fold_bn(params["bn2_gamma"], params["bn2_beta"],
                     params["bn2_mean"], params["bn2_var"], coutp)
    w1 = pack_w(params["conv1_w"], cinp, coutp)
    b1 = pad_b(params["conv1_b"], coutp)
    w2 = pack_w(params["conv2_w"], coutp, coutp)
    b2 = pad_b(params["conv2_b"], coutp)

    # Shortcut branch (feeds conv2's fused add-epilogue).
    if in_channels != out_channels or stride != 1:
        wsc = pack_w(params["sc_w"], cinp, coutp)
        bsc = pad_b(params["sc_b"], coutp)
        # 1x1 conv, stride s, no padding: single tap at padded offset (1, 1).
        sc = _fused_conv(xp, wsc, bsc, taps=[(1, 1)], stride=stride,
                         out_h=ho, out_w=wo)
    else:
        sc = xp[:, 1:h + 1, 1:w + 1, :]          # identity (cinp == coutp)

    # conv1: BN1+ReLU prologue, 3x3 stride s (computed directly on strided
    # taps), output emitted with its own zero halo for conv2.
    hpad = _fused_conv(xp, w1, b1, taps=taps3, stride=stride,
                       out_h=ho, out_w=wo, scale=s1, shift=t1, pad_out=True)

    # conv2: BN2+ReLU prologue, 3x3 stride 1, bias + shortcut add epilogue.
    # TODO(synk): nn.Dropout is identity in inference; training-mode Bernoulli
    # mask (pltpu.prng_*) omitted.
    out = _fused_conv(hpad, w2, b2, taps=taps3, stride=1,
                      out_h=ho, out_w=wo, scale=s2, shift=t2, add=sc)

    out = out[..., :out_channels]                # drop zero pad channels once
    return jnp.transpose(out, (0, 3, 1, 2))      # NHWC -> NCHW


# ---------------------------------------------------------------- reference -

def _reference(x_nchw, params, in_c, out_c, stride):
    def bn(x, g, b, m, v):
        g, b, m, v = (a.reshape(1, -1, 1, 1) for a in (g, b, m, v))
        return (x - m) / jnp.sqrt(v + _EPS) * g + b

    def conv(x, w_hwio, b, s, p):
        y = jax.lax.conv_general_dilated(
            x, w_hwio, (s, s), ((p, p), (p, p)),
            dimension_numbers=("NCHW", "HWIO", "NCHW"))
        return y + b.reshape(1, -1, 1, 1)

    h = jnp.maximum(bn(x_nchw, params["bn1_gamma"], params["bn1_beta"],
                       params["bn1_mean"], params["bn1_var"]), 0.0)
    h = conv(h, params["conv1_w"], params["conv1_b"], stride, 1)
    h = jnp.maximum(bn(h, params["bn2_gamma"], params["bn2_beta"],
                       params["bn2_mean"], params["bn2_var"]), 0.0)
    h = conv(h, params["conv2_w"], params["conv2_b"], 1, 1)
    if in_c != out_c or stride != 1:
        sc = conv(x_nchw, params["sc_w"], params["sc_b"], stride, 0)
    else:
        sc = x_nchw
    return h + sc


if __name__ == "__main__":
    key = jax.random.PRNGKey(0)
    kx, kp = jax.random.split(key)

    in_c, out_c = 4, 8
    x = jax.random.normal(kx, (2, in_c, 16, 16), jnp.float32)   # NCHW
    params = init_wide_basic_params(kp, in_c, out_c)

    for stride, out_hw in ((1, 16), (2, 8)):
        y = wide_basic_forward(x, params, in_c, out_c, stride)
        jax.block_until_ready(y)
        assert y.shape == (2, out_c, out_hw, out_hw), y.shape
        assert bool(jnp.all(jnp.isfinite(y)))
        r = _reference(x, params, in_c, out_c, stride)
        assert float(jnp.max(jnp.abs(y - r))) < 5e-2

    print("KERNEL_OK")
</pallas_src>

<mosaic_0001>
module attributes {stable_mosaic.version = 11 : i64} {
  func.func @_fused_conv_kernel(%arg0: i32, %arg1: memref<1x18x18x128xf32, #tpu.memory_space<vmem>>, %arg2: memref<128x128xf32, #tpu.memory_space<vmem>>, %arg3: memref<1x128xf32, #tpu.memory_space<vmem>>, %arg4: memref<1x16x16x128xf32, #tpu.memory_space<vmem>>) attributes {dimension_semantics = [#tpu.dimension_semantics<parallel>], iteration_bounds = array<i64: 2>, scalar_prefetch = 0 : i64, scratch_operands = 0 : i64, tpu.core_type = #tpu.core_type<tc>, window_params = [{transform_indices = @transform_0, window_bounds = array<i64: 1, 18, 18, 128>}, {pipeline_mode = #tpu.pipeline_mode<synchronous>, transform_indices = @transform_1, window_bounds = array<i64: 128, 128>}, {pipeline_mode = #tpu.pipeline_mode<synchronous>, transform_indices = @transform_2, window_bounds = array<i64: 1, 128>}, {transform_indices = @transform_3, window_bounds = array<i64: 1, 16, 16, 128>}]} {
    %c0 = arith.constant 0 : index
    %c1 = arith.constant 1 : index
    %c1_0 = arith.constant 1 : index
    %c0_1 = arith.constant 0 : index
    %0 = vector.load %arg1[%c0, %c1, %c1_0, %c0_1] : memref<1x18x18x128xf32, #tpu.memory_space<vmem>>, vector<1x16x16x128xf32>
    %1 = vector.shape_cast %0 : vector<1x16x16x128xf32> to vector<16x16x128xf32>
    %2 = vector.shape_cast %1 : vector<16x16x128xf32> to vector<256x128xf32>
    %c0_2 = arith.constant 0 : index
    %c0_3 = arith.constant 0 : index
    %3 = vector.load %arg2[%c0_2, %c0_3] : memref<128x128xf32, #tpu.memory_space<vmem>>, vector<128x128xf32>
    %cst = arith.constant dense<0.000000e+00> : vector<256x128xf32>
    %4 = tpu.matmul %2, %3, %cst {dimension_numbers = #tpu.dot_dimension_numbers<[1], [0], [0], [1], [0, 0, 1, 1], [], []>} : vector<256x128xf32>, vector<128x128xf32>, vector<256x128xf32> -> vector<256x128xf32>
    %c0_4 = arith.constant 0 : index
    %c0_5 = arith.constant 0 : index
    %5 = vector.load %arg3[%c0_4, %c0_5] : memref<1x128xf32, #tpu.memory_space<vmem>>, vector<1x128xf32>
    %6 = vector.broadcast %5 : vector<1x128xf32> to vector<256x128xf32>
    %7 = arith.addf %4, %6 : vector<256x128xf32>
    %8 = vector.shape_cast %7 : vector<256x128xf32> to vector<16x16x128xf32>
    %c0_6 = arith.constant 0 : index
    %c0_7 = arith.constant 0 : index
    %c0_8 = arith.constant 0 : index
    %c0_9 = arith.constant 0 : index
    %9 = vector.load %arg4[%c0_6, %c0_7, %c0_8, %c0_9] : memref<1x16x16x128xf32, #tpu.memory_space<vmem>>, vector<1x16x16x128xf32>
    %10 = vector.shape_cast %9 : vector<1x16x16x128xf32> to vector<16x16x128xf32>
    %11 = vector.shape_cast %8 : vector<16x16x128xf32> to vector<1x16x16x128xf32>
    tpu.vector_store %arg4[%c0_6, %c0_7, %c0_8, %c0_9], %11 {strides = array<i32>} : memref<1x16x16x128xf32, #tpu.memory_space<vmem>>, vector<1x16x16x128xf32>,
    return
  }
  func.func @transform_0(%arg0: i32) -> (i32, i32, i32, i32) {
    %c0_i32 = arith.constant 0 : i32
    %c0_i32_0 = arith.constant 0 : i32
    %c0_i32_1 = arith.constant 0 : i32
    %c0_i32_2 = arith.constant 0 : i32
    return %arg0, %c0_i32, %c0_i32_0, %c0_i32_1 : i32, i32, i32, i32
  }
  func.func @transform_1(%arg0: i32) -> (i32, i32) {
    %c0_i32 = arith.constant 0 : i32
    %c0_i32_0 = arith.constant 0 : i32
    %c0_i32_1 = arith.constant 0 : i32
    return %c0_i32, %c0_i32_0 : i32, i32
  }
  func.func @transform_2(%arg0: i32) -> (i32, i32) {
    %c0_i32 = arith.constant 0 : i32
    %c0_i32_0 = arith.constant 0 : i32
    %c0_i32_1 = arith.constant 0 : i32
    return %c0_i32, %c0_i32_0 : i32, i32
  }
  func.func @transform_3(%arg0: i32) -> (i32, i32, i32, i32) {
    %c0_i32 = arith.constant 0 : i32
    %c0_i32_0 = arith.constant 0 : i32
    %c0_i32_1 = arith.constant 0 : i32
    %c0_i32_2 = arith.constant 0 : i32
    return %arg0, %c0_i32, %c0_i32_0, %c0_i32_1 : i32, i32, i32, i32
  }
}

</mosaic_0001>

<bundles_post_ra>
// kernel: tpu_custom_call.1
= control target key start
LH: loop header
LB: loop body
LE: loop exit
PB: predicated region body
PF: predicated region fallthrough
CT: control target
= control target key end

     0   :  { %8 = vsyncpa [#allocation3], 0  ;;  %s909_s0 = inlined_call_operand.vmem [shape: f32[2,18,18,128], index: 0, kind: input, shape index: {}]   ;;  %s910_s1 = inlined_call_operand.vmem [shape: f32[128,128], index: 1, kind: input, shape index: {}]   ;;  %s911_s2 = inlined_call_operand.vmem [shape: f32[1,128], index: 2, kind: input, shape index: {}]   ;;  %s912_s3 = inlined_call_operand.hbm [shape: f32[2,16,16,128], index: 3, kind: output, shape index: {}]  }
   0x1   :  { %10 = vsyncpa [#allocation3 + $0x1], 0  ;;  %s666_s12 = smov 0   ;;  %s668_s13 = smov 0  }
   0x2   :  { %s670_s14 = smov 0   ;;  %s672_s15 = smov 0  }
   0x3 LB: > { %s687_s16 = sadd.s32 4294967295, %s642_s15   ;;  %s445_s17 = sadd.s32 4294967294, %s642_s15   ;;  %s642_s15 = sphi %s672_s15, %s918_s15   ;;  %s638_s14 = sphi %s670_s14, %s917_s14   ;;  %s634_s13 = sphi %s668_s13, %s916_s13   ;;  %s630_s12 = sphi %s666_s12, %s915_s12  }
   0x4   : > { %s691_s18 = sadd.s32 1, %s642_s15   ;;  %s91_s19 = sadd.s32 1, %s638_s14 }
   0x5   : > { %s88_s20 = ssub.s32 %s642_s15, %s691_s18  ;;  %p101_p0 = scmp.ne.s32.totalorder %s638_s14, %s634_s13 }
   0x6   : > { %p89_p1 = scmp.eq.s32.totalorder %s88_s20, 0  ;;  %p102_p2 = scmp.eq.s32.totalorder %s687_s16, 1 }
   0x7   : > { %p107_p3 = scmp.ne.s32.totalorder %s634_s13, %s630_s12  ;;  %p108_p4 = scmp.eq.s32.totalorder %s445_s17, 1 }
   0x8   : > { %s702_s21 = scalar_select %p89_p1, %s638_s14, %s91_s19  }
   0x9   : > { %p704_p5 = por %p102_p2, %p101_p0  ;;  %p708_p6 = por %p108_p4, %p107_p3 }
   0xa   : > { %p448_p7 = scmp.ge.s32.totalorder %s642_s15, 1  ;;  %p140_p8 = scmp.lt.s32.totalorder %s642_s15, 3 }
   0xc   : > { %p141_p9 = pnand %p448_p7, %p140_p8 }
   0xd   : > { %p164_p10 = scmp.lt.s32.totalorder (!%p141_p9), %s687_s16, 1  ;;  %s161_s25 = sand.u32 (!%p141_p9), 1, %s634_s13  }
   0xe   : > { %144 = sbr.rel (%p141_p9) target bundleno = 246 (0xf6), region = 32  ;;  %s449_s26 = sshll.u32 (!%p141_p9), %s161_s25, 8 }
   0xf   : > { %s811_s29 = scalar_lea.vmem (!%p141_p9), [#allocation2], %s449_s26  ;;  %s488_s30 = sshll.u32 (!%p141_p9), %s687_s16, 8 }
  0x10   : > { %s368_s8 = scalar_lea.sflag (!%p141_p9), [#allocation3], %s161_s25 }
  0x13   : > { %v217_v0 = vld [vmem:[%s910_s1 + $0x78] sm:$0xff]  ;;  %v216_v1 = vld [vmem:[%s910_s1 + $0x70] sm:$0xff]  ;;  %v215_v2 = vld [vmem:[%s910_s1 + $0x68] sm:$0xff]  ;;  %s165_s28 = scalar_select %p164_p10, %s687_s16, 1 }
  0x14   : > { %490 = vmatpush.msra.mxu2 %v217_v0  ;;  %491 = vmatpush.msra.mxu3 %v217_v0  ;;  %v214_v3 = vld [vmem:[%s910_s1 + $0x60] sm:$0xff]  ;;  %v213_v4 = vld [vmem:[%s910_s1 + $0x58] sm:$0xff]  ;;  %v212_v5 = vld [vmem:[%s910_s1 + $0x50] sm:$0xff]  ;;  %s380_s16 = sshll.u32 %s811_s29, 4  ;;  %s381_s16 = int_to_ptr.vmem [resolvable:$true] %s380_s16 }
  0x15   : > { %222 = vmatpush.msra.mxu0 %v217_v0  ;;  %489 = vmatpush.msra.mxu1 %v217_v0  ;;  %v211_v6 = vld [vmem:[%s910_s1 + $0x48] sm:$0xff]  ;;  %v210_v7 = vld [vmem:[%s910_s1 + $0x40] sm:$0xff]  ;;  %v209_v8 = vld [vmem:[%s910_s1 + $0x38] sm:$0xff]  ;;  %s537_s6 = smul.u32 432, %s165_s28 }
  0x16   : > { %493 = vmatpush.msra.mxu2 %v216_v1  ;;  %494 = vmatpush.msra.mxu3 %v216_v1  ;;  %v208_v9 = vld [vmem:[%s910_s1 + $0x30] sm:$0xff]  ;;  %v207_v10 = vld [vmem:[%s910_s1 + $0x28] sm:$0xff]  ;;  %v206_v11 = vld [vmem:[%s910_s1 + $0x20] sm:$0xff] }
  0x17   : > { %223 = vmatpush.msra.mxu0 %v216_v1  ;;  %492 = vmatpush.msra.mxu1 %v216_v1  ;;  %v205_v12 = vld [vmem:[%s910_s1 + $0x18] sm:$0xff]  ;;  %v204_v13 = vld [vmem:[%s910_s1 + $0x10] sm:$0xff]  ;;  %v203_v14 = vld [vmem:[%s910_s1 + $0x8] sm:$0xff]  ;;  %s764_s19 = scalar_lea.vmem %s909_s0, %s537_s6  ;;  %s379_s6 = scalar_lea.hbm %s912_s3, %s488_s30 }
  0x18   : > { %496 = vmatpush.msra.mxu2 %v215_v2  ;;  %497 = vmatpush.msra.mxu3 %v215_v2  ;;  %v202_v15 = vld [vmem:[%s910_s1] sm:$0xff]  ;;  %v469_v24 = vld [vmem:[%s764_s19 + $0xf1] sm:$0xff]  ;;  %v471_v32 = vld [vmem:[%s764_s19 + $0x109] sm:$0xff]  ;;  %s382_s7 = sshll.u32 %s379_s6, 4  ;;  %s383_s7 = int_to_ptr.hbm [resolvable:$true] %s382_s7 }
  0x19   : > { %224 = vmatpush.msra.mxu0 %v215_v2  ;;  %495 = vmatpush.msra.mxu1 %v215_v2  ;;  %v467_v16 = vld [vmem:[%s764_s19 + $0xd9] sm:$0xff]  ;;  %v468_v20 = vld [vmem:[%s764_s19 + $0xe1] sm:$0xff]  ;;  %v477_v25 = vld [vmem:[%s764_s19 + $0x151] sm:$0xff]  ;;  %s594_s9 = sshra.s32 %s383_s7, 4  ;;  %s595_s9 = int_to_ptr.hbm [resolvable:$true] %s594_s9 }
  0x1a   : > { %499 = vmatpush.msra.mxu2 %v214_v3  ;;  %500 = vmatpush.msra.mxu3 %v214_v3  ;;  %v475_v17 = vld [vmem:[%s764_s19 + $0x139] sm:$0xff]  ;;  %v476_v21 = vld [vmem:[%s764_s19 + $0x141] sm:$0xff]  ;;  %v453_v26 = vld [vmem:[%s764_s19 + $0x31] sm:$0xff]  ;;  %s596_s10 = scalar_lea.hbm %s595_s9, 256  ;;  %p601_p0 = scmp.lt.s32.totalorder %s595_s9, %s912_s3 }
  0x1b   : > { %225 = vmatpush.msra.mxu0 %v214_v3  ;;  %498 = vmatpush.msra.mxu1 %v214_v3  ;;  %v451_v18 = vld [vmem:[%s764_s19 + $0x19] sm:$0xff]  ;;  %v452_v22 = vld [vmem:[%s764_s19 + $0x21] sm:$0xff]  ;;  %v461_v27 = vld [vmem:[%s764_s19 + $0x91] sm:$0xff]  ;;  %p597_p11 = scmp.ne.s32.totalorder %s595_s9, %s596_s10 }
  0x1c   : > { %502 = vmatpush.msra.mxu2 %v213_v4  ;;  %503 = vmatpush.msra.mxu3 %v213_v4  ;;  %v459_v19 = vld [vmem:[%s764_s19 + $0x79] sm:$0xff]  ;;  %v460_v23 = vld [vmem:[%s764_s19 + $0x81] sm:$0xff]  ;;  %v479_v33 = vld [vmem:[%s764_s19 + $0x169] sm:$0xff] }
  0x1d   : > { %226 = vmatpush.msra.mxu0 %v213_v4  ;;  %501 = vmatpush.msra.mxu1 %v213_v4  ;;  %v470_v28 = vld [vmem:[%s764_s19 + $0xf9] sm:$0xff]  ;;  %v455_v34 = vld [vmem:[%s764_s19 + $0x49] sm:$0xff]  ;;  %v472_v36 = vld [vmem:[%s764_s19 + $0x111] sm:$0xff]  ;;  %p598_p12 = pnand %p597_p11, %p704_p5 }
  0x1e   : > { %505 = vmatpush.msra.mxu2 %v212_v5  ;;  %506 = vmatpush.msra.mxu3 %v212_v5  ;;  %v478_v29 = vld [vmem:[%s764_s19 + $0x159] sm:$0xff]  ;;  %v463_v35 = vld [vmem:[%s764_s19 + $0xa9] sm:$0xff]  ;;  %v480_v37 = vld [vmem:[%s764_s19 + $0x171] sm:$0xff] }
  0x1f   : > { %227 = vmatpush.msra.mxu0 %v212_v5  ;;  %504 = vmatpush.msra.mxu1 %v212_v5  ;;  %v454_v30 = vld [vmem:[%s764_s19 + $0x39] sm:$0xff]  ;;  %v456_v38 = vld [vmem:[%s764_s19 + $0x51] sm:$0xff]  ;;  %v473_v40 = vld [vmem:[%s764_s19 + $0x121] sm:$0xff]  ;;  %p599_p13 = pneg %p598_p12 }
  0x20   : > { %508 = vmatpush.msra.mxu2 %v211_v6  ;;  %509 = vmatpush.msra.mxu3 %v211_v6  ;;  %v462_v31 = vld [vmem:[%s764_s19 + $0x99] sm:$0xff]  ;;  %v464_v39 = vld [vmem:[%s764_s19 + $0xb1] sm:$0xff]  ;;  %v481_v41 = vld [vmem:[%s764_s19 + $0x181] sm:$0xff] }
  0x21   : > { %228 = vmatpush.msra.mxu0 %v211_v6  ;;  %507 = vmatpush.msra.mxu1 %v211_v6  ;;  %v457_v42 = vld [vmem:[%s764_s19 + $0x61] sm:$0xff]  ;;  %v474_v44 = vld [vmem:[%s764_s19 + $0x129] sm:$0xff]  ;;  %v807_v48 = vld [vmem:[%s911_s2] ss:$0 sm:$0xff] }
  0x22   : > { %511 = vmatpush.msra.mxu2 %v210_v7  ;;  %512 = vmatpush.msra.mxu3 %v210_v7  ;;  %v465_v43 = vld [vmem:[%s764_s19 + $0xc1] sm:$0xff]  ;;  %v482_v45 = vld [vmem:[%s764_s19 + $0x189] sm:$0xff] }
  0x23   : > { %229 = vmatpush.msra.mxu0 %v210_v7  ;;  %510 = vmatpush.msra.mxu1 %v210_v7  ;;  %v458_v46 = vld [vmem:[%s764_s19 + $0x69] sm:$0xff] }
  0x24   : > { %514 = vmatpush.msra.mxu2 %v209_v8  ;;  %515 = vmatpush.msra.mxu3 %v209_v8  ;;  %v466_v47 = vld [vmem:[%s764_s19 + $0xc9] sm:$0xff]  ;;  %s600_s19 = scalar_lea.hbm %s912_s3, 512 }
  0x25   : > { %230 = vmatpush.msra.mxu0 %v209_v8  ;;  %513 = vmatpush.msra.mxu1 %v209_v8  ;;  %p602_p1 = scmp.lt.s32.totalorder %s600_s19, %s596_s10 }
  0x26   : > { %517 = vmatpush.msra.mxu2 %v208_v9  ;;  %518 = vmatpush.msra.mxu3 %v208_v9 }
  0x27   : > { %231 = vmatpush.msra.mxu0 %v208_v9  ;;  %516 = vmatpush.msra.mxu1 %v208_v9  ;;  %p603_p2 = por %p602_p1, %p601_p0 }
  0x28   : > { %520 = vmatpush.msra.mxu2 %v207_v10  ;;  %521 = vmatpush.msra.mxu3 %v207_v10 }
  0x29   : > { %232 = vmatpush.msra.mxu0 %v207_v10  ;;  %519 = vmatpush.msra.mxu1 %v207_v10  ;;  %p604_p3 = pnand %p603_p2, %p599_p13 }
  0x2a   : > { %523 = vmatpush.msra.mxu2 %v206_v11  ;;  %524 = vmatpush.msra.mxu3 %v206_v11 }
  0x2b   : > { %233 = vmatpush.msra.mxu0 %v206_v11  ;;  %522 = vmatpush.msra.mxu1 %v206_v11 }
  0x2c   : > { %526 = vmatpush.msra.mxu2 %v205_v12  ;;  %527 = vmatpush.msra.mxu3 %v205_v12 }
  0x2d   : > { %234 = vmatpush.msra.mxu0 %v205_v12  ;;  %525 = vmatpush.msra.mxu1 %v205_v12 }
  0x2e   : > { %529 = vmatpush.msra.mxu2 %v204_v13  ;;  %530 = vmatpush.msra.mxu3 %v204_v13 }
  0x2f   : > { %235 = vmatpush.msra.mxu0 %v204_v13  ;;  %528 = vmatpush.msra.mxu1 %v204_v13 }
  0x30   : > { %532 = vmatpush.msra.mxu2 %v203_v14  ;;  %533 = vmatpush.msra.mxu3 %v203_v14 }
  0x31   : > { %236 = vmatpush.msra.mxu0 %v203_v14  ;;  %531 = vmatpush.msra.mxu1 %v203_v14 }
  0x32   : > { %535 = vmatpush.msra.mxu2 %v202_v15  ;;  %536 = vmatpush.msra.mxu3 %v202_v15 }
  0x33   : > { %286 = vmatmul.f32.vlgmr.msra.gmra.mxu2 %v467_v16  ;;  %310 = vmatmul.f32.vlgmr.msra.gmra.mxu3 %v475_v17 }
  0x34   : > { %237 = vmatpush.msra.mxu0 %v202_v15  ;;  %534 = vmatpush.msra.mxu1 %v202_v15 }
  0x35   : > { %238 = vmatmul.f32.vlgmr.msra.gmra.mxu0 %v451_v18  ;;  %262 = vmatmul.f32.vlgmr.msra.gmra.mxu1 %v459_v19 }
  0x3b   : > { %289 = vmatmul.f32.gmra.mxu2 %v468_v20  ;;  %313 = vmatmul.f32.gmra.mxu3 %v476_v21 }
  0x3d   : > { %241 = vmatmul.f32.gmra.mxu0 %v452_v22  ;;  %265 = vmatmul.f32.gmra.mxu1 %v460_v23 }
  0x43   : > { %292 = vmatmul.f32.gmra.mxu2 %v469_v24  ;;  %316 = vmatmul.f32.gmra.mxu3 %v477_v25 }
  0x45   : > { %244 = vmatmul.f32.gmra.mxu0 %v453_v26  ;;  %268 = vmatmul.f32.gmra.mxu1 %v461_v27 }
  0x4b   : > { %295 = vmatmul.f32.gmra.mxu2 %v470_v28  ;;  %319 = vmatmul.f32.gmra.mxu3 %v478_v29 }
  0x4d   : > { %247 = vmatmul.f32.gmra.mxu0 %v454_v30  ;;  %271 = vmatmul.f32.gmra.mxu1 %v462_v31 }
  0x53   : > { %298 = vmatmul.f32.gmra.mxu2 %v471_v32  ;;  %322 = vmatmul.f32.gmra.mxu3 %v479_v33 }
  0x55   : > { %250 = vmatmul.f32.gmra.mxu0 %v455_v34  ;;  %274 = vmatmul.f32.gmra.mxu1 %v463_v35 }
  0x5b   : > { %301 = vmatmul.f32.gmra.mxu2 %v472_v36  ;;  %325 = vmatmul.f32.gmra.mxu3 %v480_v37 }
  0x5d   : > { %253 = vmatmul.f32.gmra.mxu0 %v456_v38  ;;  %277 = vmatmul.f32.gmra.mxu1 %v464_v39 }
  0x63   : > { %304 = vmatmul.f32.gmra.mxu2 %v473_v40  ;;  %328 = vmatmul.f32.gmra.mxu3 %v481_v41 }
  0x65   : > { %256 = vmatmul.f32.gmra.mxu0 %v457_v42  ;;  %280 = vmatmul.f32.gmra.mxu1 %v465_v43 }
  0x6b   : > { %307 = vmatmul.f32.gmra.mxu2 %v474_v44  ;;  %331 = vmatmul.f32.gmra.mxu3 %v482_v45 }
  0x6d   : > { %259 = vmatmul.f32.gmra.mxu0 %v458_v46  ;;  %283 = vmatmul.f32.gmra.mxu1 %v466_v47 }
  0xb2   : > { %v239_v49 = vpop.f32.mrf.mxu0  ;;  %v263_v50 = vpop.f32.mrf.mxu1 }
  0xb3   : > { %v240_v51 = vadd.f32 %v807_v48, %v239_v49  ;;  %v264_v52 = vadd.f32 %v807_v48, %v263_v50 }
  0xb5   : > { %335 = vst [vmem:[%s811_s29] sm:$0xff] %v240_v51 }
  0xb6   : > { %343 = vst [vmem:[%s811_s29 + $0x40] sm:$0xff] %v264_v52  ;;  %v287_v53 = vpop.f32.mrf.mxu2  ;;  %v311_v54 = vpop.f32.mrf.mxu3 }
  0xb7   : > { %v288_v55 = vadd.f32 %v807_v48, %v287_v53  ;;  %v312_v56 = vadd.f32 %v807_v48, %v311_v54 }
  0xb9   : > { %351 = vst [vmem:[%s811_s29 + $0x80] sm:$0xff] %v288_v55 }
  0xba   : > { %359 = vst [vmem:[%s811_s29 + $0xc0] sm:$0xff] %v312_v56  ;;  %v242_v57 = vpop.f32.mrf.mxu0  ;;  %v266_v58 = vpop.f32.mrf.mxu1 }
  0xbb   : > { %v243_v59 = vadd.f32 %v807_v48, %v242_v57  ;;  %v267_v60 = vadd.f32 %v807_v48, %v266_v58 }
  0xbd   : > { %336 = vst [vmem:[%s811_s29 + $0x8] sm:$0xff] %v243_v59 }
  0xbe   : > { %344 = vst [vmem:[%s811_s29 + $0x48] sm:$0xff] %v267_v60  ;;  %v290_v61 = vpop.f32.mrf.mxu2  ;;  %v314_v62 = vpop.f32.mrf.mxu3 }
  0xbf   : > { %v291_v63 = vadd.f32 %v807_v48, %v290_v61  ;;  %v315_v0 = vadd.f32 %v807_v48, %v314_v62 }
  0xc1   : > { %352 = vst [vmem:[%s811_s29 + $0x88] sm:$0xff] %v291_v63 }
  0xc2   : > { %360 = vst [vmem:[%s811_s29 + $0xc8] sm:$0xff] %v315_v0  ;;  %v245_v1 = vpop.f32.mrf.mxu0  ;;  %v269_v2 = vpop.f32.mrf.mxu1 }
  0xc3   : > { %v246_v3 = vadd.f32 %v807_v48, %v245_v1  ;;  %v270_v4 = vadd.f32 %v807_v48, %v269_v2 }
  0xc5   : > { %337 = vst [vmem:[%s811_s29 + $0x10] sm:$0xff] %v246_v3 }
  0xc6   : > { %345 = vst [vmem:[%s811_s29 + $0x50] sm:$0xff] %v270_v4  ;;  %v293_v5 = vpop.f32.mrf.mxu2  ;;  %v317_v6 = vpop.f32.mrf.mxu3 }
  0xc7   : > { %v294_v7 = vadd.f32 %v807_v48, %v293_v5  ;;  %v318_v8 = vadd.f32 %v807_v48, %v317_v6 }
  0xc9   : > { %353 = vst [vmem:[%s811_s29 + $0x90] sm:$0xff] %v294_v7 }
  0xca   : > { %361 = vst [vmem:[%s811_s29 + $0xd0] sm:$0xff] %v318_v8  ;;  %v248_v9 = vpop.f32.mrf.mxu0  ;;  %v272_v10 = vpop.f32.mrf.mxu1 }
  0xcb   : > { %v249_v11 = vadd.f32 %v807_v48, %v248_v9  ;;  %v273_v12 = vadd.f32 %v807_v48, %v272_v10 }
  0xcd   : > { %338 = vst [vmem:[%s811_s29 + $0x18] sm:$0xff] %v249_v11 }
  0xce   : > { %346 = vst [vmem:[%s811_s29 + $0x58] sm:$0xff] %v273_v12  ;;  %v296_v13 = vpop.f32.mrf.mxu2  ;;  %v320_v14 = vpop.f32.mrf.mxu3 }
  0xcf   : > { %v297_v15 = vadd.f32 %v807_v48, %v296_v13  ;;  %v321_v16 = vadd.f32 %v807_v48, %v320_v14 }
  0xd1   : > { %354 = vst [vmem:[%s811_s29 + $0x98] sm:$0xff] %v297_v15 }
  0xd2   : > { %362 = vst [vmem:[%s811_s29 + $0xd8] sm:$0xff] %v321_v16  ;;  %v251_v17 = vpop.f32.mrf.mxu0  ;;  %v275_v18 = vpop.f32.mrf.mxu1 }
  0xd3   : > { %v252_v19 = vadd.f32 %v807_v48, %v251_v17  ;;  %v276_v20 = vadd.f32 %v807_v48, %v275_v18 }
  0xd5   : > { %339 = vst [vmem:[%s811_s29 + $0x20] sm:$0xff] %v252_v19 }
  0xd6   : > { %347 = vst [vmem:[%s811_s29 + $0x60] sm:$0xff] %v276_v20  ;;  %v299_v21 = vpop.f32.mrf.mxu2  ;;  %v323_v22 = vpop.f32.mrf.mxu3 }
  0xd7   : > { %v300_v23 = vadd.f32 %v807_v48, %v299_v21  ;;  %v324_v24 = vadd.f32 %v807_v48, %v323_v22 }
  0xd9   : > { %355 = vst [vmem:[%s811_s29 + $0xa0] sm:$0xff] %v300_v23 }
  0xda   : > { %363 = vst [vmem:[%s811_s29 + $0xe0] sm:$0xff] %v324_v24  ;;  %v254_v25 = vpop.f32.mrf.mxu0  ;;  %v278_v26 = vpop.f32.mrf.mxu1 }
  0xdb   : > { %v255_v27 = vadd.f32 %v807_v48, %v254_v25  ;;  %v279_v28 = vadd.f32 %v807_v48, %v278_v26 }
  0xdd   : > { %340 = vst [vmem:[%s811_s29 + $0x28] sm:$0xff] %v255_v27 }
  0xde   : > { %348 = vst [vmem:[%s811_s29 + $0x68] sm:$0xff] %v279_v28  ;;  %v302_v29 = vpop.f32.mrf.mxu2  ;;  %v326_v30 = vpop.f32.mrf.mxu3 }
  0xdf   : > { %v303_v31 = vadd.f32 %v807_v48, %v302_v29  ;;  %v327_v32 = vadd.f32 %v807_v48, %v326_v30 }
  0xe1   : > { %356 = vst [vmem:[%s811_s29 + $0xa8] sm:$0xff] %v303_v31 }
  0xe2   : > { %364 = vst [vmem:[%s811_s29 + $0xe8] sm:$0xff] %v327_v32  ;;  %v257_v33 = vpop.f32.mrf.mxu0  ;;  %v281_v34 = vpop.f32.mrf.mxu1 }
  0xe3   : > { %v258_v35 = vadd.f32 %v807_v48, %v257_v33  ;;  %v282_v36 = vadd.f32 %v807_v48, %v281_v34 }
  0xe5   : > { %341 = vst [vmem:[%s811_s29 + $0x30] sm:$0xff] %v258_v35 }
  0xe6   : > { %349 = vst [vmem:[%s811_s29 + $0x70] sm:$0xff] %v282_v36  ;;  %v305_v37 = vpop.f32.mrf.mxu2  ;;  %v329_v38 = vpop.f32.mrf.mxu3 }
  0xe7   : > { %v306_v39 = vadd.f32 %v807_v48, %v305_v37  ;;  %v330_v40 = vadd.f32 %v807_v48, %v329_v38 }
  0xe9   : > { %357 = vst [vmem:[%s811_s29 + $0xb0] sm:$0xff] %v306_v39 }
  0xea   : > { %365 = vst [vmem:[%s811_s29 + $0xf0] sm:$0xff] %v330_v40  ;;  %v260_v41 = vpop.f32.mrf.mxu0  ;;  %v284_v42 = vpop.f32.mrf.mxu1 }
  0xeb   : > { %v261_v43 = vadd.f32 %v807_v48, %v260_v41  ;;  %v285_v44 = vadd.f32 %v807_v48, %v284_v42 }
  0xed   : > { %342 = vst [vmem:[%s811_s29 + $0x38] sm:$0xff] %v261_v43 }
  0xee   : > { %350 = vst [vmem:[%s811_s29 + $0x78] sm:$0xff] %v285_v44  ;;  %v308_v45 = vpop.f32.mrf.mxu2  ;;  %v332_v46 = vpop.f32.mrf.mxu3 }
  0xef   : > { %v309_v47 = vadd.f32 %v807_v48, %v308_v45  ;;  %v333_v49 = vadd.f32 %v807_v48, %v332_v46 }
  0xf1   : > { %358 = vst [vmem:[%s811_s29 + $0xb8] sm:$0xff] %v309_v47 }
  0xf2   : > { %366 = vst [vmem:[%s811_s29 + $0xf8] sm:$0xff] %v333_v49 }
  0xf3   : > { %607 = shalt.err (!%p604_p3)
}
  0xf4   : > { %s644_s25 = smov 128   ;;  %s645_s26 = smov 8  }
  0xf5   : > { %538 = dma.vmem_to_hbm [thread:$0]  (%p704_p5), %s381_s16, 4096, %s383_s7, %s368_s8, %s644_s25, %s644_s25, %s645_s26  }
  0xf6 PF: > { %p544_p4 = scmp.ge.s32.totalorder %s642_s15, 2  ;;  %s397_s27 = sand.u32 1, %s630_s12  }
  0xf7   : > { %s398_s28 = scalar_lea.sflag [#allocation3], %s397_s27 }
  0xf8   : > { %p541_p7 = pnand %p544_p4, %p708_p6 }
  0xfa   : > { %p542_p8 = pneg %p541_p7 }
  0xfc   : > { %625 = dma.done.wait (%p542_p8), %s398_s28, 4096  }
  0xfd   : > { %627 = vsyncadd (%p542_p8), %s398_s28, 4294963200  ;;  %p13_p9 = scmp.ge.s32.totalorder %s691_s18, 4   ;;  %s915_s12 = smov %s634_s13 }
  0xfe   : > { %s916_s13 = smov %s638_s14  ;;  %s917_s14 = smov %s702_s21 }
  0xff   : > { %s918_s15 = smov %s691_s18  ;;  %15 = sbr.rel (!%p13_p9) target bundleno = 3 (0x3), region = 68 }
 0x104   :  { %404 = vsyncpa [#allocation3], 1 }
 0x105   :  { %406 = vsyncpa [#allocation3 + $0x1], 1 }

</bundles_post_ra>
